<compile_context>
chip_gen: v7x
topology: tpu7x:2x2x1
jax: 0.10.0
libtpu: 0.0.40
codegen_flags: <defaults>
</compile_context>

<pallas_src>
import functools

import jax
import jax.numpy as jnp
from jax.experimental import pallas as pl
from jax.experimental.pallas import tpu as pltpu

_LANE = 128      # vreg lane width (last dim)
_SUBLANE = 8     # f32 sublane count (second-to-last dim)
_VMEM_BUDGET = 24 * 1024 * 1024   # stay under the 32 MiB scoped default (v7x-safe)


def _round_up(x, m):
    return (x + m - 1) // m * m


def _fused_mlp_kernel(*refs, num_layers):
    """refs = (x_ref, w0_ref, b0_ref, ..., w{L-1}_ref, b{L-1}_ref, o_ref)."""
    x_ref = refs[0]
    o_ref = refs[-1]
    h = x_ref[...]                                   # (tm, D0_pad) f32
    for l in range(num_layers):
        w_ref = refs[1 + 2 * l]                      # (Dl_pad, Dl1_pad) bf16
        b_ref = refs[2 + 2 * l]                      # (1, Dl1_pad) f32
        acc = jnp.dot(h.astype(jnp.bfloat16), w_ref[...],
                      preferred_element_type=jnp.float32)   # MXU, f32 accumulate
        h = jnp.maximum(acc + b_ref[...], 0.0)       # f32 bias + ReLU epilogue (VPU)
    o_ref[...] = h.astype(o_ref.dtype)


@functools.partial(jax.jit, static_argnames=("feature_dim",))
def fc_body_forward(x, prepared_params, feature_dim):
    """x: (B, state_dim) f32. prepared_params: tuple of (w_pad bf16, b_pad f32)."""
    B, D0 = x.shape
    num_layers = len(prepared_params)
    d0_pad = prepared_params[0][0].shape[0]
    dl_pad = prepared_params[-1][0].shape[1]

    # Batch tile: whole (sublane-padded) batch for small B, 128-row tiles otherwise.
    tm = 128 if B >= 128 else _round_up(max(B, 1), _SUBLANE)
    b_pad = _round_up(B, tm)

    x_p = jnp.zeros((b_pad, d0_pad), jnp.float32).at[:B, :D0].set(x)

    # Rough VMEM sanity check (weights resident + double-buffered x/out tiles).
    w_bytes = sum(w.size * 2 + b.size * 4 for w, b in prepared_params)
    act_bytes = 2 * tm * (d0_pad + dl_pad) * 4
    assert w_bytes + act_bytes < _VMEM_BUDGET, (
        "FCBody too large for single fused kernel; TODO(synk): add K/N tiling.")

    in_specs = [pl.BlockSpec((tm, d0_pad), lambda i: (i, 0))]
    flat_inputs = [x_p]
    for w_p, b_p in prepared_params:
        in_specs.append(pl.BlockSpec(w_p.shape, lambda i: (0, 0)))   # loaded once
        in_specs.append(pl.BlockSpec(b_p.shape, lambda i: (0, 0)))   # loaded once
        flat_inputs += [w_p, b_p]

    out = pl.pallas_call(
        functools.partial(_fused_mlp_kernel, num_layers=num_layers),
        out_shape=jax.ShapeDtypeStruct((b_pad, dl_pad), jnp.float32),
        grid_spec=pl.GridSpec(
            grid=(b_pad // tm,),
            in_specs=in_specs,
            out_specs=pl.BlockSpec((tm, dl_pad), lambda i: (i, 0)),
        ),
        compiler_params=pltpu.CompilerParams(
            dimension_semantics=("parallel",),
        ),
    )(*flat_inputs)

    return out[:B, :feature_dim]


def init_fc_body_params(key, state_dim, hidden_units=(128, 128), w_scale=1.0):
    """Matches PyTorch layer_init: orthogonal weights * w_scale, bias = 0.1.

    Returns list of (w (Din, Dout) f32, b (Dout,) f32) — weights already
    transposed from PyTorch's (out, in) so the kernel computes x @ W + b.
    """
    dims = (state_dim,) + tuple(hidden_units)
    ortho = jax.nn.initializers.orthogonal()
    params = []
    for dim_in, dim_out in zip(dims[:-1], dims[1:]):
        key, sub = jax.random.split(key)
        w_pt = ortho(sub, (dim_out, dim_in), jnp.float32) * w_scale  # PyTorch (out, in)
        params.append((jnp.transpose(w_pt), jnp.full((dim_out,), 0.1, jnp.float32)))
    return params


def prepare_fc_body_params(params):
    """Zero-pad every feature dim to 128 lanes; weights -> bf16, biases stay f32.

    Zero padding is exact: padded input lanes are 0, padded weight rows/cols are
    0, padded bias lanes are 0, so padded output lanes stay 0 through ReLU.
    """
    prepared = []
    for w, b in params:
        din, dout = w.shape
        din_p, dout_p = _round_up(din, _LANE), _round_up(dout, _LANE)
        w_p = jnp.zeros((din_p, dout_p), jnp.bfloat16).at[:din, :dout].set(
            w.astype(jnp.bfloat16))
        b_p = jnp.zeros((1, dout_p), jnp.float32).at[:, :dout].set(b.reshape(1, dout))
        prepared.append((w_p, b_p))
    return tuple(prepared)


if __name__ == "__main__":
    key = jax.random.PRNGKey(0)
    k_params, k_x = jax.random.split(key)

    batch = 8
    state_dim = 16
    hidden_units = (32, 32)

    params = init_fc_body_params(k_params, state_dim, hidden_units)
    prepared = prepare_fc_body_params(params)
    x = jax.random.normal(k_x, (batch, state_dim), jnp.float32)

    out = fc_body_forward(x, prepared, feature_dim=hidden_units[-1])
    out = jax.block_until_ready(out)

    # Pure-JAX f32 reference (loose tolerance: kernel matmuls use bf16 inputs).
    ref = x
    for w, b in params:
        ref = jnp.maximum(ref @ w + b, 0.0)

    assert out.shape == (batch, hidden_units[-1])
    assert bool(jnp.all(out >= 0.0))          # ReLU gate
    assert bool(jnp.allclose(out, ref, rtol=5e-2, atol=5e-2))
    print("KERNEL_OK")
</pallas_src>

<mosaic_0001>
module attributes {stable_mosaic.version = 11 : i64} {
  func.func @_fused_mlp_kernel(%arg0: i32, %arg1: memref<8x128xf32, #tpu.memory_space<vmem>>, %arg2: memref<128x128xbf16, #tpu.memory_space<vmem>>, %arg3: memref<1x128xf32, #tpu.memory_space<vmem>>, %arg4: memref<128x128xbf16, #tpu.memory_space<vmem>>, %arg5: memref<1x128xf32, #tpu.memory_space<vmem>>, %arg6: memref<8x128xf32, #tpu.memory_space<vmem>>) attributes {dimension_semantics = [#tpu.dimension_semantics<parallel>], iteration_bounds = array<i64: 1>, scalar_prefetch = 0 : i64, scratch_operands = 0 : i64, tpu.core_type = #tpu.core_type<tc>, window_params = [{transform_indices = @transform_0, window_bounds = array<i64: 8, 128>}, {pipeline_mode = #tpu.pipeline_mode<synchronous>, transform_indices = @transform_1, window_bounds = array<i64: 128, 128>}, {pipeline_mode = #tpu.pipeline_mode<synchronous>, transform_indices = @transform_2, window_bounds = array<i64: 1, 128>}, {pipeline_mode = #tpu.pipeline_mode<synchronous>, transform_indices = @transform_3, window_bounds = array<i64: 128, 128>}, {pipeline_mode = #tpu.pipeline_mode<synchronous>, transform_indices = @transform_4, window_bounds = array<i64: 1, 128>}, {transform_indices = @transform_5, window_bounds = array<i64: 8, 128>}]} {
    %c0 = arith.constant 0 : index
    %c0_0 = arith.constant 0 : index
    %0 = vector.load %arg1[%c0, %c0_0] : memref<8x128xf32, #tpu.memory_space<vmem>>, vector<8x128xf32>
    %1 = arith.truncf %0 : vector<8x128xf32> to vector<8x128xbf16>
    %c0_1 = arith.constant 0 : index
    %c0_2 = arith.constant 0 : index
    %2 = vector.load %arg2[%c0_1, %c0_2] : memref<128x128xbf16, #tpu.memory_space<vmem>>, vector<128x128xbf16>
    %cst = arith.constant dense<0.000000e+00> : vector<8x128xf32>
    %3 = tpu.matmul %1, %2, %cst {dimension_numbers = #tpu.dot_dimension_numbers<[1], [0], [0], [1], [0, 0, 1, 1], [], []>} : vector<8x128xbf16>, vector<128x128xbf16>, vector<8x128xf32> -> vector<8x128xf32>
    %c0_3 = arith.constant 0 : index
    %c0_4 = arith.constant 0 : index
    %4 = vector.load %arg3[%c0_3, %c0_4] : memref<1x128xf32, #tpu.memory_space<vmem>>, vector<1x128xf32>
    %5 = vector.broadcast %4 : vector<1x128xf32> to vector<8x128xf32>
    %6 = arith.addf %3, %5 : vector<8x128xf32>
    %cst_5 = arith.constant 0.000000e+00 : f32
    %7 = vector.broadcast %cst_5 : f32 to vector<8x128xf32>
    %8 = arith.maximumf %6, %7 : vector<8x128xf32>
    %9 = arith.truncf %8 : vector<8x128xf32> to vector<8x128xbf16>
    %c0_6 = arith.constant 0 : index
    %c0_7 = arith.constant 0 : index
    %10 = vector.load %arg4[%c0_6, %c0_7] : memref<128x128xbf16, #tpu.memory_space<vmem>>, vector<128x128xbf16>
    %cst_8 = arith.constant dense<0.000000e+00> : vector<8x128xf32>
    %11 = tpu.matmul %9, %10, %cst_8 {dimension_numbers = #tpu.dot_dimension_numbers<[1], [0], [0], [1], [0, 0, 1, 1], [], []>} : vector<8x128xbf16>, vector<128x128xbf16>, vector<8x128xf32> -> vector<8x128xf32>
    %c0_9 = arith.constant 0 : index
    %c0_10 = arith.constant 0 : index
    %12 = vector.load %arg5[%c0_9, %c0_10] : memref<1x128xf32, #tpu.memory_space<vmem>>, vector<1x128xf32>
    %13 = vector.broadcast %12 : vector<1x128xf32> to vector<8x128xf32>
    %14 = arith.addf %11, %13 : vector<8x128xf32>
    %cst_11 = arith.constant 0.000000e+00 : f32
    %15 = vector.broadcast %cst_11 : f32 to vector<8x128xf32>
    %16 = arith.maximumf %14, %15 : vector<8x128xf32>
    %c0_12 = arith.constant 0 : index
    %c0_13 = arith.constant 0 : index
    %17 = vector.load %arg6[%c0_12, %c0_13] : memref<8x128xf32, #tpu.memory_space<vmem>>, vector<8x128xf32>
    tpu.vector_store %arg6[%c0_12, %c0_13], %16 {strides = array<i32>} : memref<8x128xf32, #tpu.memory_space<vmem>>, vector<8x128xf32>,
    return
  }
  func.func @transform_0(%arg0: i32) -> (i32, i32) {
    %c0_i32 = arith.constant 0 : i32
    %c0_i32_0 = arith.constant 0 : i32
    return %arg0, %c0_i32 : i32, i32
  }
  func.func @transform_1(%arg0: i32) -> (i32, i32) {
    %c0_i32 = arith.constant 0 : i32
    %c0_i32_0 = arith.constant 0 : i32
    %c0_i32_1 = arith.constant 0 : i32
    return %c0_i32, %c0_i32_0 : i32, i32
  }
  func.func @transform_2(%arg0: i32) -> (i32, i32) {
    %c0_i32 = arith.constant 0 : i32
    %c0_i32_0 = arith.constant 0 : i32
    %c0_i32_1 = arith.constant 0 : i32
    return %c0_i32, %c0_i32_0 : i32, i32
  }
  func.func @transform_3(%arg0: i32) -> (i32, i32) {
    %c0_i32 = arith.constant 0 : i32
    %c0_i32_0 = arith.constant 0 : i32
    %c0_i32_1 = arith.constant 0 : i32
    return %c0_i32, %c0_i32_0 : i32, i32
  }
  func.func @transform_4(%arg0: i32) -> (i32, i32) {
    %c0_i32 = arith.constant 0 : i32
    %c0_i32_0 = arith.constant 0 : i32
    %c0_i32_1 = arith.constant 0 : i32
    return %c0_i32, %c0_i32_0 : i32, i32
  }
  func.func @transform_5(%arg0: i32) -> (i32, i32) {
    %c0_i32 = arith.constant 0 : i32
    %c0_i32_0 = arith.constant 0 : i32
    return %arg0, %c0_i32 : i32, i32
  }
}

</mosaic_0001>

<bundles_post_ra>
// kernel: fc_body_forward.1
= control target key start
LH: loop header
LB: loop body
LE: loop exit
PB: predicated region body
PF: predicated region fallthrough
CT: control target
= control target key end

     0   :  { %10 = vsyncpa [#allocation3], 0  ;;  %s547_s0 = inlined_call_operand.vmem [shape: f32[8,128], index: 0, kind: input, shape index: {}]   ;;  %s548_s1 = inlined_call_operand.hbm [shape: bf16[128,128], index: 1, kind: input, shape index: {}]   ;;  %s549_s2 = inlined_call_operand.vmem [shape: f32[1,128], index: 2, kind: input, shape index: {}]   ;;  %s550_s3 = inlined_call_operand.hbm [shape: bf16[128,128], index: 3, kind: input, shape index: {}]   ;;  %s551_s4 = inlined_call_operand.vmem [shape: f32[1,128], index: 4, kind: input, shape index: {}]   ;;  %s552_s5 = inlined_call_operand.hbm [shape: f32[8,128], index: 5, kind: output, shape index: {}]  }
   0x1   :  { %11 = vsyncpa [#allocation6], 0 }
   0x2   :  { %12 = vsyncpa [#allocation4], 0  ;;  %s465_s18 = smov [#allocation2]   ;;  %s393_s22 = scalar_lea.hbm %s548_s1, 1024 }
   0x3   :  { %s20_s19 = sshll.u32 %s465_s18, 4  ;;  %p394_p0 = scmp.ne.s32.totalorder %s548_s1, %s393_s22  ;;  %s21_s19 = int_to_ptr.vmem [resolvable:$true] %s20_s19 }
   0x4   :  { %p397_p1 = scmp.lt.u32.totalorder %s393_s22, %s548_s1 }
   0x6   :  { %p399_p2 = pnand %p397_p1, %p394_p0 }
   0x8   :  { %402 = shalt.err (!%p399_p2)
}
   0x9   :  { %s403_s27 = scalar_lea.vmem %s21_s19, 1024  ;;  %p408_p4 = scmp.lt.s32.totalorder %s21_s19, %s21_s19 }
   0xa   :  { %p404_p3 = scmp.ne.s32.totalorder %s21_s19, %s403_s27  ;;  %p409_p5 = scmp.lt.s32.totalorder %s403_s27, %s403_s27 }
   0xc   :  { %p410_p6 = por %p409_p5, %p408_p4 }
   0xe   :  { %p411_p7 = pnand %p410_p6, %p404_p3 }
  0x10   :  { %414 = shalt.err (!%p411_p7)
}
  0x11   :  { %s466_s28 = smov 64   ;;  %s467_s29 = smov 4  }
  0x12   :  { %26 = dma.hbm_to_vmem [thread:$0]  %s548_s1, 1024, %s21_s19, [#allocation3], %s466_s28, %s466_s28, %s467_s29  }
  0x13   :  { %s468_s7 = smov [#allocation5]   ;;  %s415_s11 = scalar_lea.hbm %s550_s3, 1024 }
  0x14   :  { %s34_s8 = sshll.u32 %s468_s7, 4  ;;  %p416_p8 = scmp.ne.s32.totalorder %s550_s3, %s415_s11  ;;  %s35_s8 = int_to_ptr.vmem [resolvable:$true] %s34_s8 }
  0x15   :  { %p419_p9 = scmp.lt.u32.totalorder %s415_s11, %s550_s3 }
  0x17   :  { %p421_p10 = pnand %p419_p9, %p416_p8 }
  0x19   :  { %424 = shalt.err (!%p421_p10)
}
  0x1a   :  { %s425_s16 = scalar_lea.vmem %s35_s8, 1024  ;;  %p430_p12 = scmp.lt.s32.totalorder %s35_s8, %s35_s8 }
  0x1b   :  { %p426_p11 = scmp.ne.s32.totalorder %s35_s8, %s425_s16  ;;  %p431_p13 = scmp.lt.s32.totalorder %s425_s16, %s425_s16 }
  0x1d   :  { %p432_p0 = por %p431_p13, %p430_p12 }
  0x1f   :  { %p433_p1 = pnand %p432_p0, %p426_p11 }
  0x21   :  { %436 = shalt.err (!%p433_p1)
}
  0x22   :  { %40 = dma.hbm_to_vmem [thread:$0]  %s550_s3, 1024, %s35_s8, [#allocation6], %s466_s28, %s466_s28, %s467_s29  }
  0x23   :  { %459 = dma.done.wait [#allocation3], 1024  }
  0x24   :  { %460 = vsyncadd [#allocation3], 4294966272 }
  0x25   :  { %461 = dma.done.wait [#allocation6], 1024  }
  0x26   :  { %462 = vsyncadd [#allocation6], 4294966272  ;;  %v469_v0 = vmov 0.0   ;;  %vm470_vm0 = vmmov 0   ;;  %v377_v1 = vld [vmem:[#allocation2] sm:$0xff]   ;;  %v378_v2 = vld [vmem:[#allocation2 + $0x8] sm:$0xff]  }
  0x27   :  { %330 = vmatprep.subr.bf16.mxu0 %v469_v0  ;;  %346 = vmatprep.mubr.msk.bf16.mxu0 %vm470_vm0, %v469_v0  ;;  %v379_v3 = vld [vmem:[#allocation2 + $0x10] sm:$0xff]   ;;  %v385_v4 = vld [vmem:[#allocation5] sm:$0xff]   ;;  %v380_v5 = vld [vmem:[#allocation2 + $0x18] sm:$0xff]   ;;  %s471_s22 = smov [#allocation7]  }
  0x28   :  { %350 = vmatprep.subr.bf16.mxu1 %v469_v0  ;;  %366 = vmatprep.mubr.msk.bf16.mxu1 %vm470_vm0, %v469_v0  ;;  %v386_v6 = vld [vmem:[#allocation5 + $0x8] sm:$0xff]   ;;  %v381_v7 = vld [vmem:[#allocation2 + $0x20] sm:$0xff]   ;;  %v387_v8 = vld [vmem:[#allocation5 + $0x10] sm:$0xff]   ;;  %s284_s23 = sshll.u32 %s471_s22, 4  ;;  %s285_s23 = int_to_ptr.vmem [resolvable:$true] %s284_s23 }
  0x29   :  { %331 = vmatpush3.bf16.msra.mxu0 %v377_v1  ;;  %351 = vmatpush3.bf16.msra.mxu1 %v385_v4  ;;  %v382_v9 = vld [vmem:[#allocation2 + $0x28] sm:$0xff]   ;;  %v388_v10 = vld [vmem:[#allocation5 + $0x18] sm:$0xff]   ;;  %v383_v11 = vld [vmem:[#allocation2 + $0x30] sm:$0xff]   ;;  %p442_p3 = scmp.lt.s32.totalorder %s285_s23, %s285_s23 }
  0x2a   :  { %332 = vmatprep.subr.bf16.mxu0 %v469_v0  ;;  %352 = vmatprep.subr.bf16.mxu1 %v469_v0  ;;  %v389_v12 = vld [vmem:[#allocation5 + $0x20] sm:$0xff]   ;;  %v384_v13 = vld [vmem:[#allocation2 + $0x38] sm:$0xff]   ;;  %v390_v15 = vld [vmem:[#allocation5 + $0x28] sm:$0xff]  }
  0x2b   :  { %v50_v14 = vld [vmem:[%s547_s0] sm:$0xff]  ;;  %v391_v17 = vld [vmem:[#allocation5 + $0x30] sm:$0xff]   ;;  %v392_v18 = vld [vmem:[#allocation5 + $0x38] sm:$0xff]  }
  0x2c   :  { %v51_v16 = vpack.c.bf16 %v50_v14, %v50_v14  ;;  %v294_v19 = vld [vmem:[%s549_s2] ss:$0 sm:$0xff]  ;;  %s437_s2 = scalar_lea.vmem %s285_s23, 128 }
  0x2d   :  { %333 = vmatpush3.bf16.msra.mxu0 %v378_v2  ;;  %353 = vmatpush3.bf16.msra.mxu1 %v386_v6  ;;  %v303_v27 = vld [vmem:[%s551_s4] ss:$0 sm:$0xff]  ;;  %p438_p2 = scmp.ne.s32.totalorder %s285_s23, %s437_s2  ;;  %p443_p4 = scmp.lt.s32.totalorder %s437_s2, %s437_s2 }
  0x2e   :  { %334 = vmatprep.subr.bf16.mxu0 %v469_v0  ;;  %354 = vmatprep.subr.bf16.mxu1 %v469_v0 }
  0x2f   :  { %p444_p5 = por %p443_p4, %p442_p3 }
  0x31   :  { %335 = vmatpush3.bf16.msra.mxu0 %v379_v3  ;;  %355 = vmatpush3.bf16.msra.mxu1 %v387_v8  ;;  %p445_p6 = pnand %p444_p5, %p438_p2 }
  0x32   :  { %336 = vmatprep.subr.bf16.mxu0 %v469_v0  ;;  %356 = vmatprep.subr.bf16.mxu1 %v469_v0 }
  0x35   :  { %337 = vmatpush3.bf16.msra.mxu0 %v380_v5  ;;  %357 = vmatpush3.bf16.msra.mxu1 %v388_v10 }
  0x36   :  { %338 = vmatprep.subr.bf16.mxu0 %v469_v0  ;;  %358 = vmatprep.subr.bf16.mxu1 %v469_v0 }
  0x39   :  { %339 = vmatpush3.bf16.msra.mxu0 %v381_v7  ;;  %359 = vmatpush3.bf16.msra.mxu1 %v389_v12 }
  0x3a   :  { %340 = vmatprep.subr.bf16.mxu0 %v469_v0  ;;  %360 = vmatprep.subr.bf16.mxu1 %v469_v0 }
  0x3d   :  { %341 = vmatpush3.bf16.msra.mxu0 %v382_v9  ;;  %361 = vmatpush3.bf16.msra.mxu1 %v390_v15 }
  0x3e   :  { %342 = vmatprep.subr.bf16.mxu0 %v469_v0  ;;  %362 = vmatprep.subr.bf16.mxu1 %v469_v0 }
  0x41   :  { %343 = vmatpush3.bf16.msra.mxu0 %v383_v11  ;;  %363 = vmatpush3.bf16.msra.mxu1 %v391_v17 }
  0x42   :  { %344 = vmatprep.subr.bf16.mxu0 %v469_v0  ;;  %364 = vmatprep.subr.bf16.mxu1 %v469_v0 }
  0x45   :  { %345 = vmatpush3.bf16.msra.mxu0 %v384_v13  ;;  %365 = vmatpush3.bf16.msra.mxu1 %v392_v18 }
  0x48   :  { %347 = vmatmul.mubr.bf16.vlgmr.msra.gmra.mrb[0].mxu0 %v51_v16 }
 0x11b   :  { %v157_v20 = vpop.f32.mrb[0].mxu0 }
 0x11c   :  { %v158_v21 = vadd.f32 %v294_v19, %v157_v20  ;;  %v348_v22 = vpop.f32.mrb[1].mxu0 }
 0x11d   :  { %v160_v23 = vpop.f32.mrb[2].mxu0 }
 0x11e   :  { %v163_v24 = vmax.f32 %v158_v21, 0.0  ;;  %v349_v25 = vpop.f32.mrb[3].mxu0 }
 0x120   :  { %v164_v26 = vpack.c.bf16 %v163_v24, %v163_v24 }
 0x122   :  { %367 = vmatmul.mubr.bf16.vlgmr.msra.gmra.mrb[0].mxu1 %v164_v26 }
 0x1f5   :  { %v270_v28 = vpop.f32.mrb[0].mxu1 }
 0x1f6   :  { %v271_v29 = vadd.f32 %v303_v27, %v270_v28  ;;  %v368_v30 = vpop.f32.mrb[1].mxu1 }
 0x1f7   :  { %v273_v31 = vpop.f32.mrb[2].mxu1 }
 0x1f8   :  { %v276_v32 = vmax.f32 %v271_v29, 0.0  ;;  %v369_v33 = vpop.f32.mrb[3].mxu1 }
 0x1fa   :  { %277 = vst [vmem:[#allocation7] sm:$0xff] %v276_v32 }
 0x1fb   :  { %448 = shalt.err (!%p445_p6)
}
 0x1fc   :  { %s449_s4 = scalar_lea.hbm %s552_s5, 128 }
 0x1fd   :  { %p450_p7 = scmp.ne.s32.totalorder %s552_s5, %s449_s4  ;;  %p453_p8 = scmp.lt.u32.totalorder %s449_s4, %s552_s5 }
 0x1ff   :  { %p455_p9 = pnand %p453_p8, %p450_p7 }
 0x201   :  { %458 = shalt.err (!%p455_p9)
}
 0x202   :  { %287 = dma.vmem_to_hbm [thread:$0]  %s285_s23, 128, %s552_s5, [#allocation4]  }
 0x203   :  { %463 = dma.done.wait [#allocation4], 128  }
 0x204   :  { %464 = vsyncadd [#allocation4], 4294967168 }
 0x205   :  { %291 = vsyncpa [#allocation3], 1 }
 0x206   :  { %292 = vsyncpa [#allocation6], 1 }
 0x207   :  { %293 = vsyncpa [#allocation4], 1 }

</bundles_post_ra>
